<compile_context>
chip_gen: v7x
topology: tpu7x:2x2x1
jax: 0.10.0
libtpu: 0.0.40
codegen_flags: <defaults>
</compile_context>

<pallas_src>
import functools
import math

import jax
import jax.numpy as jnp
from jax import lax
from jax.experimental import pallas as pl
from jax.experimental.pallas import tpu as pltpu


def _gp_kernel(km_ref, x_ref, wq_ref, wv_ref, bq_ref, bv_ref, out_ref, v_scr,
               *, tq, head_size):
    # km_ref: (1, S_pad) f32   additive key mask (0 valid / -1e12 invalid)
    # x_ref:  (S_pad, hidden)  bf16  full (padded) sequence for this batch
    # wq_ref/wv_ref: (hidden, D) bf16  per-head projection (rope + 1/sqrt(D)
    #                                  pre-folded into the q side)
    # bq_ref/bv_ref: (1, D) f32        per-head bias (same folding)
    # out_ref: (1, 1, tq, S_pad) f32   score tile for (b, h, q-tile)
    # v_scr:   (S_pad, D) bf16         whole-sequence v for current (b, h)
    qi = pl.program_id(2)
    S_pad = x_ref.shape[0]
    D = head_size

    # Compute v for the whole (padded) sequence once per (batch, head); it is
    # reused across all query tiles.  The q-tile grid axis is "arbitrary" so
    # this carry across grid steps is safe under megacore sharding.
    @pl.when(qi == 0)
    def _():
        v = jnp.dot(x_ref[...], wv_ref[...],
                    preferred_element_type=jnp.float32) + bv_ref[...]
        v_scr[...] = v.astype(v_scr.dtype)

    # q for this query tile only (already pre-scaled by 1/sqrt(D)).
    row0 = pl.multiple_of(qi * tq, tq)
    xq = x_ref[pl.ds(row0, tq), :]                                  # [tq, hidden]
    q = jnp.dot(xq, wq_ref[...],
                preferred_element_type=jnp.float32) + bq_ref[...]   # [tq, D] f32
    q = q.astype(v_scr.dtype)                                       # bf16 for MXU

    # scores = q @ v^T : contract the last dims directly (no explicit .T).
    scores = lax.dot_general(q, v_scr[...], (((1,), (1,)), ((), ())),
                             preferred_element_type=jnp.float32)    # [tq, S_pad]

    # GlobalPointer.scores_mask(): keep strictly-upper (col > row) positions
    # whose key token is valid; everything else gets -1e12 added.  The key
    # validity is pre-baked into km (0 or -1e12), so a single select suffices.
    km = km_ref[...]                                                # (1, S_pad)
    row = lax.broadcasted_iota(jnp.int32, (tq, S_pad), 0) + row0
    col = lax.broadcasted_iota(jnp.int32, (tq, S_pad), 1)
    out_ref[0, 0] = scores + jnp.where(col > row, km, jnp.float32(-1e12))


def _prepare_params(weight, bias, emb_cos, emb_sin, trans4tensor,
                    num_heads, head_size, if_rope, compute_dtype):
    """Fold the rope diagonal scale and 1/sqrt(D) into the dense parameters."""
    hidden = weight.shape[0]
    H, D = num_heads, head_size
    if if_rope:
        # The module's "rope" is q*cos + q*t4*sin == q * (cos + t4*sin): a
        # per-feature diagonal scale with no position dependence, so it folds
        # exactly into the dense weight/bias.
        alpha = (emb_cos.astype(jnp.float32)
                 + trans4tensor.astype(jnp.float32) * emb_sin.astype(jnp.float32))
    else:
        alpha = jnp.ones((D,), jnp.float32)
    inv_sqrt_d = 1.0 / math.sqrt(D)
    # columns are laid out as [head h][q|v][d]  (matches transpose_for_scores)
    w = weight.astype(jnp.float32).reshape(hidden, H, 2, D) * alpha
    wq = (jnp.transpose(w[:, :, 0, :], (1, 0, 2)) * inv_sqrt_d
          ).astype(compute_dtype)                                    # [H, hidden, D]
    wv = jnp.transpose(w[:, :, 1, :], (1, 0, 2)).astype(compute_dtype)  # [H, hidden, D]
    b = bias.astype(jnp.float32).reshape(H, 2, D) * alpha
    bq = b[:, 0:1, :] * inv_sqrt_d                                   # [H, 1, D] f32
    bv = b[:, 1:2, :]                                                # [H, 1, D] f32
    return wq, wv, bq, bv


def _vmem_estimate(S_pad, hidden, D, tq):
    """Rough VMEM footprint (double-buffered blocks + persistent scratch)."""
    lane = lambda d: ((d + 127) // 128) * 128
    est = 2 * (S_pad * lane(hidden) * 2         # x (bf16)
               + 8 * lane(S_pad) * 4            # additive key mask (f32)
               + 2 * hidden * lane(D) * 2       # wq + wv (bf16)
               + 2 * 8 * lane(D) * 4            # bq + bv (f32)
               + tq * lane(S_pad) * 4)          # out tile (f32)
    est += S_pad * lane(D) * 2                  # v scratch (bf16)
    return est


def global_pointer_forward(x, attention_mask, weight, bias, emb_cos, emb_sin,
                           trans4tensor, *, num_heads, head_size, if_rope=True):
    """x: [B, S, hidden] f32; attention_mask: [B, S] (0/1). Returns [B, H, S, S] f32."""
    B, S, hidden = x.shape
    H, D = num_heads, head_size
    compute_dtype = jnp.bfloat16   # MXU inputs; accumulation stays f32

    wq, wv, bq, bv = _prepare_params(weight, bias, emb_cos, emb_sin,
                                     trans4tensor, H, D, if_rope, compute_dtype)

    # Pad the sequence so output blocks are lane-dense (last dim % 128 == 0).
    S_pad = ((S + 127) // 128) * 128
    VMEM_CEIL = 40 << 20
    TQ = 128
    for cand in (512, 256):
        if S_pad % cand == 0 and _vmem_estimate(S_pad, hidden, D, cand) <= VMEM_CEIL:
            TQ = cand
            break
    n_q = S_pad // TQ
    pad_s = S_pad - S

    x_p = jnp.pad(x.astype(jnp.float32),
                  ((0, 0), (0, pad_s), (0, 0))).astype(compute_dtype)
    am_p = jnp.pad(attention_mask.astype(jnp.float32), ((0, 0), (0, pad_s)))
    # Additive key mask: 0 where the key token is valid, -1e12 elsewhere
    # (padded keys are invalid).  Computed once outside the hot path.
    km_p = jnp.where(am_p > 0.5, 0.0, -1e12).astype(jnp.float32).reshape(B, 1, S_pad)

    kernel = functools.partial(_gp_kernel, tq=TQ, head_size=D)

    est = _vmem_estimate(S_pad, hidden, D, TQ)
    vmem_limit = int(min(max(est + (8 << 20), 16 << 20), 64 << 20))

    out = pl.pallas_call(
        kernel,
        # TODO(synk): emit bf16 scores (halves the dominant HBM writeback) if
        # the downstream consumer of the [B,H,S,S] logits tolerates it.
        out_shape=jax.ShapeDtypeStruct((B, H, S_pad, S_pad), jnp.float32),
        grid_spec=pltpu.PrefetchScalarGridSpec(
            num_scalar_prefetch=0,
            grid=(B, H, n_q),
            in_specs=[
                pl.BlockSpec((None, 1, S_pad), lambda b, h, qi: (b, 0, 0)),      # km
                pl.BlockSpec((None, S_pad, hidden), lambda b, h, qi: (b, 0, 0)), # x
                pl.BlockSpec((None, hidden, D), lambda b, h, qi: (h, 0, 0)),     # Wq
                pl.BlockSpec((None, hidden, D), lambda b, h, qi: (h, 0, 0)),     # Wv
                pl.BlockSpec((None, 1, D), lambda b, h, qi: (h, 0, 0)),          # bq
                pl.BlockSpec((None, 1, D), lambda b, h, qi: (h, 0, 0)),          # bv
            ],
            out_specs=pl.BlockSpec((1, 1, TQ, S_pad),
                                   lambda b, h, qi: (b, h, qi, 0)),
            scratch_shapes=[pltpu.VMEM((S_pad, D), compute_dtype)],
        ),
        compiler_params=pltpu.CompilerParams(
            dimension_semantics=("parallel", "parallel", "arbitrary"),
            vmem_limit_bytes=vmem_limit),
    )(km_p, x_p, wq, wv, bq, bv)

    return out[:, :, :S, :S]


def _reference_forward(x, attention_mask, weight, bias, emb_cos, emb_sin,
                       trans4tensor, *, num_heads, head_size, if_rope=True):
    """Pure-JAX f32 reference mirroring the PyTorch module exactly."""
    B, S, _ = x.shape
    y = jnp.einsum("bsh,ho->bso", x, weight) + bias
    y = y.reshape(B, S, num_heads, 2 * head_size).transpose(0, 2, 1, 3)
    q, v = y[..., :head_size], y[..., head_size:]
    if if_rope:
        q = q * emb_cos + q * trans4tensor * emb_sin
        v = v * emb_cos + v * trans4tensor * emb_sin
    scores = jnp.einsum("bhqd,bhkd->bhqk", q, v) / math.sqrt(head_size)
    am = attention_mask.astype(jnp.float32)[:, None, None, :]
    low_tri = 1.0 - jnp.tril(jnp.ones((S, S), jnp.float32))
    m = jnp.maximum(am + low_tri - 1.0, 0.0)
    return scores + (1.0 - m) * (-1e12)


if __name__ == "__main__":
    B, S, hidden = 2, 8, 32
    num_heads, head_size = 2, 16
    H2D = num_heads * head_size * 2

    key = jax.random.PRNGKey(0)
    kx, kw, kb = jax.random.split(key, 3)

    x = jax.random.normal(kx, (B, S, hidden), dtype=jnp.float32)
    # synthetic parameters for nn.Linear(hidden, H*D*2) (stored transposed)
    weight = jax.random.normal(kw, (hidden, H2D), dtype=jnp.float32) * 0.05
    bias = jax.random.normal(kb, (H2D,), dtype=jnp.float32) * 0.01
    # attention mask: first few tokens valid per batch
    lengths = jnp.array([6, 8], dtype=jnp.int32)
    attention_mask = (jnp.arange(S)[None, :] < lengths[:, None]).astype(jnp.float32)

    # RoPE buffers exactly as in the module's __init__
    idx = jnp.arange(0, head_size // 2, dtype=jnp.float32)
    idx = jnp.power(10000.0, -2.0 * idx / head_size)
    emb_cos = jnp.repeat(jnp.cos(idx), 2, axis=-1)        # [head_size]
    emb_sin = jnp.repeat(jnp.sin(idx), 2, axis=-1)        # [head_size]
    trans4tensor = jnp.tile(jnp.array([-1.0, 1.0], jnp.float32), head_size // 2)

    out = global_pointer_forward(x, attention_mask, weight, bias, emb_cos,
                                 emb_sin, trans4tensor,
                                 num_heads=num_heads, head_size=head_size)
    out = jax.block_until_ready(out)

    ref = _reference_forward(x, attention_mask, weight, bias, emb_cos, emb_sin,
                             trans4tensor, num_heads=num_heads,
                             head_size=head_size)
    assert out.shape == (B, num_heads, S, S)
    # bf16 MXU inputs (f32 accumulation) vs pure-f32 reference -> loose tol.
    assert jnp.allclose(out, ref, rtol=2e-2, atol=2e-2), "mismatch vs reference"

    print("KERNEL_OK")
</pallas_src>

<mosaic_0001>
module attributes {stable_mosaic.version = 11 : i64} {
  func.func @_gp_kernel(%arg0: i32, %arg1: i32, %arg2: i32, %arg3: memref<1x1x128xf32, #tpu.memory_space<vmem>>, %arg4: memref<1x128x32xbf16, #tpu.memory_space<vmem>>, %arg5: memref<1x32x16xbf16, #tpu.memory_space<vmem>>, %arg6: memref<1x32x16xbf16, #tpu.memory_space<vmem>>, %arg7: memref<1x1x16xf32, #tpu.memory_space<vmem>>, %arg8: memref<1x1x16xf32, #tpu.memory_space<vmem>>, %arg9: memref<1x1x128x128xf32, #tpu.memory_space<vmem>>, %arg10: memref<128x16xbf16, #tpu.memory_space<vmem>>) attributes {dimension_semantics = [#tpu.dimension_semantics<parallel>, #tpu.dimension_semantics<parallel>, #tpu.dimension_semantics<arbitrary>], iteration_bounds = array<i64: 2, 2, 1>, scalar_prefetch = 0 : i64, scratch_operands = 1 : i64, tpu.core_type = #tpu.core_type<tc>, window_params = [{transform_indices = @transform_0, window_bounds = array<i64: 1, 1, 128>}, {transform_indices = @transform_1, window_bounds = array<i64: 1, 128, 32>}, {transform_indices = @transform_2, window_bounds = array<i64: 1, 32, 16>}, {transform_indices = @transform_3, window_bounds = array<i64: 1, 32, 16>}, {transform_indices = @transform_4, window_bounds = array<i64: 1, 1, 16>}, {transform_indices = @transform_5, window_bounds = array<i64: 1, 1, 16>}, {transform_indices = @transform_6, window_bounds = array<i64: 1, 1, 128, 128>}]} {
    %c0_i32 = arith.constant 0 : i32
    %0 = arith.cmpi eq, %arg2, %c0_i32 : i32
    %1 = arith.extui %0 : i1 to i32
    %c0_i32_0 = arith.constant 0 : i32
    %2 = arith.cmpi ne, %1, %c0_i32_0 : i32
    scf.if %2 {
      %c0_19 = arith.constant 0 : index
      %c0_20 = arith.constant 0 : index
      %c0_21 = arith.constant 0 : index
      %33 = vector.load %arg4[%c0_19, %c0_20, %c0_21] : memref<1x128x32xbf16, #tpu.memory_space<vmem>>, vector<1x128x32xbf16>
      %34 = vector.shape_cast %33 : vector<1x128x32xbf16> to vector<128x32xbf16>
      %c0_22 = arith.constant 0 : index
      %c0_23 = arith.constant 0 : index
      %c0_24 = arith.constant 0 : index
      %35 = vector.load %arg6[%c0_22, %c0_23, %c0_24] : memref<1x32x16xbf16, #tpu.memory_space<vmem>>, vector<1x32x16xbf16>
      %36 = vector.shape_cast %35 : vector<1x32x16xbf16> to vector<32x16xbf16>
      %cst_25 = arith.constant dense<0.000000e+00> : vector<128x16xf32>
      %37 = tpu.matmul %34, %36, %cst_25 {dimension_numbers = #tpu.dot_dimension_numbers<[1], [0], [0], [1], [0, 0, 1, 1], [], []>} : vector<128x32xbf16>, vector<32x16xbf16>, vector<128x16xf32> -> vector<128x16xf32>
      %c0_26 = arith.constant 0 : index
      %c0_27 = arith.constant 0 : index
      %c0_28 = arith.constant 0 : index
      %38 = vector.load %arg8[%c0_26, %c0_27, %c0_28] : memref<1x1x16xf32, #tpu.memory_space<vmem>>, vector<1x1x16xf32>
      %39 = vector.shape_cast %38 : vector<1x1x16xf32> to vector<1x16xf32>
      %40 = vector.broadcast %39 : vector<1x16xf32> to vector<128x16xf32>
      %41 = arith.addf %37, %40 : vector<128x16xf32>
      %42 = arith.truncf %41 : vector<128x16xf32> to vector<128x16xbf16>
      %c0_29 = arith.constant 0 : index
      %c0_30 = arith.constant 0 : index
      %43 = vector.load %arg10[%c0_29, %c0_30] : memref<128x16xbf16, #tpu.memory_space<vmem>>, vector<128x16xbf16>
      tpu.vector_store %arg10[%c0_29, %c0_30], %42 {strides = array<i32>} : memref<128x16xbf16, #tpu.memory_space<vmem>>, vector<128x16xbf16>,
    } else {
    }
    %c128_i32 = arith.constant 128 : i32
    %3 = arith.muli %arg2, %c128_i32 : i32
    %4 = tpu.assume_multiple %3, 128 : i32
    %c0 = arith.constant 0 : index
    %5 = arith.index_cast %4 : i32 to index
    %c0_1 = arith.constant 0 : index
    %6 = vector.load %arg4[%c0, %5, %c0_1] : memref<1x128x32xbf16, #tpu.memory_space<vmem>>, vector<1x128x32xbf16>
    %7 = vector.shape_cast %6 : vector<1x128x32xbf16> to vector<128x32xbf16>
    %c0_2 = arith.constant 0 : index
    %c0_3 = arith.constant 0 : index
    %c0_4 = arith.constant 0 : index
    %8 = vector.load %arg5[%c0_2, %c0_3, %c0_4] : memref<1x32x16xbf16, #tpu.memory_space<vmem>>, vector<1x32x16xbf16>
    %9 = vector.shape_cast %8 : vector<1x32x16xbf16> to vector<32x16xbf16>
    %cst = arith.constant dense<0.000000e+00> : vector<128x16xf32>
    %10 = tpu.matmul %7, %9, %cst {dimension_numbers = #tpu.dot_dimension_numbers<[1], [0], [0], [1], [0, 0, 1, 1], [], []>} : vector<128x32xbf16>, vector<32x16xbf16>, vector<128x16xf32> -> vector<128x16xf32>
    %c0_5 = arith.constant 0 : index
    %c0_6 = arith.constant 0 : index
    %c0_7 = arith.constant 0 : index
    %11 = vector.load %arg7[%c0_5, %c0_6, %c0_7] : memref<1x1x16xf32, #tpu.memory_space<vmem>>, vector<1x1x16xf32>
    %12 = vector.shape_cast %11 : vector<1x1x16xf32> to vector<1x16xf32>
    %13 = vector.broadcast %12 : vector<1x16xf32> to vector<128x16xf32>
    %14 = arith.addf %10, %13 : vector<128x16xf32>
    %15 = arith.truncf %14 : vector<128x16xf32> to vector<128x16xbf16>
    %c0_8 = arith.constant 0 : index
    %c0_9 = arith.constant 0 : index
    %16 = vector.load %arg10[%c0_8, %c0_9] : memref<128x16xbf16, #tpu.memory_space<vmem>>, vector<128x16xbf16>
    %cst_10 = arith.constant dense<0.000000e+00> : vector<128x128xf32>
    %17 = tpu.matmul %15, %16, %cst_10 {dimension_numbers = #tpu.dot_dimension_numbers<[1], [1], [0], [0], [0, 0, 1, 0], [], []>} : vector<128x16xbf16>, vector<128x16xbf16>, vector<128x128xf32> -> vector<128x128xf32>
    %c0_11 = arith.constant 0 : index
    %c0_12 = arith.constant 0 : index
    %c0_13 = arith.constant 0 : index
    %18 = vector.load %arg3[%c0_11, %c0_12, %c0_13] : memref<1x1x128xf32, #tpu.memory_space<vmem>>, vector<1x1x128xf32>
    %19 = vector.shape_cast %18 : vector<1x1x128xf32> to vector<1x128xf32>
    %20 = tpu.iota {dimensions = array<i32: 0>} : vector<128x128xi32>
    %21 = vector.broadcast %4 : i32 to vector<128x128xi32>
    %22 = arith.addi %20, %21 : vector<128x128xi32>
    %23 = tpu.iota {dimensions = array<i32: 1>} : vector<128x128xi32>
    %24 = arith.cmpi sgt, %23, %22 : vector<128x128xi32>
    %cst_14 = arith.constant -9.99999995E+11 : f32
    %25 = vector.shape_cast %19 : vector<1x128xf32> to vector<1x128xf32>
    %26 = vector.broadcast %25 : vector<1x128xf32> to vector<128x128xf32>
    %27 = vector.broadcast %cst_14 : f32 to vector<128x128xf32>
    %28 = arith.select %24, %26, %27 : vector<128x128xi1>, vector<128x128xf32>
    %29 = arith.addf %17, %28 : vector<128x128xf32>
    %c0_15 = arith.constant 0 : index
    %c0_16 = arith.constant 0 : index
    %c0_17 = arith.constant 0 : index
    %c0_18 = arith.constant 0 : index
    %30 = vector.load %arg9[%c0_15, %c0_16, %c0_17, %c0_18] : memref<1x1x128x128xf32, #tpu.memory_space<vmem>>, vector<1x1x128x128xf32>
    %31 = vector.shape_cast %30 : vector<1x1x128x128xf32> to vector<128x128xf32>
    %32 = vector.shape_cast %29 : vector<128x128xf32> to vector<1x1x128x128xf32>
    tpu.vector_store %arg9[%c0_15, %c0_16, %c0_17, %c0_18], %32 {strides = array<i32>} : memref<1x1x128x128xf32, #tpu.memory_space<vmem>>, vector<1x1x128x128xf32>,
    return
  }
  func.func @transform_0(%arg0: i32, %arg1: i32, %arg2: i32) -> (i32, i32, i32) {
    %c0_i32 = arith.constant 0 : i32
    %c0_i32_0 = arith.constant 0 : i32
    %c0_i32_1 = arith.constant 0 : i32
    return %arg0, %c0_i32, %c0_i32_0 : i32, i32, i32
  }
  func.func @transform_1(%arg0: i32, %arg1: i32, %arg2: i32) -> (i32, i32, i32) {
    %c0_i32 = arith.constant 0 : i32
    %c0_i32_0 = arith.constant 0 : i32
    %c0_i32_1 = arith.constant 0 : i32
    return %arg0, %c0_i32, %c0_i32_0 : i32, i32, i32
  }
  func.func @transform_2(%arg0: i32, %arg1: i32, %arg2: i32) -> (i32, i32, i32) {
    %c0_i32 = arith.constant 0 : i32
    %c0_i32_0 = arith.constant 0 : i32
    %c0_i32_1 = arith.constant 0 : i32
    return %arg1, %c0_i32, %c0_i32_0 : i32, i32, i32
  }
  func.func @transform_3(%arg0: i32, %arg1: i32, %arg2: i32) -> (i32, i32, i32) {
    %c0_i32 = arith.constant 0 : i32
    %c0_i32_0 = arith.constant 0 : i32
    %c0_i32_1 = arith.constant 0 : i32
    return %arg1, %c0_i32, %c0_i32_0 : i32, i32, i32
  }
  func.func @transform_4(%arg0: i32, %arg1: i32, %arg2: i32) -> (i32, i32, i32) {
    %c0_i32 = arith.constant 0 : i32
    %c0_i32_0 = arith.constant 0 : i32
    %c0_i32_1 = arith.constant 0 : i32
    return %arg1, %c0_i32, %c0_i32_0 : i32, i32, i32
  }
  func.func @transform_5(%arg0: i32, %arg1: i32, %arg2: i32) -> (i32, i32, i32) {
    %c0_i32 = arith.constant 0 : i32
    %c0_i32_0 = arith.constant 0 : i32
    %c0_i32_1 = arith.constant 0 : i32
    return %arg1, %c0_i32, %c0_i32_0 : i32, i32, i32
  }
  func.func @transform_6(%arg0: i32, %arg1: i32, %arg2: i32) -> (i32, i32, i32, i32) {
    %c0_i32 = arith.constant 0 : i32
    %c0_i32_0 = arith.constant 0 : i32
    return %arg0, %arg1, %arg2, %c0_i32 : i32, i32, i32, i32
  }
}

</mosaic_0001>

<bundles_post_ra>
// kernel: tpu_custom_call.1
= control target key start
LH: loop header
LB: loop body
LE: loop exit
PB: predicated region body
PF: predicated region fallthrough
CT: control target
= control target key end

     0   :  { %11 = vsyncpa [#allocation4], 0  ;;  %s1995_s0 = inlined_call_operand.vmem [shape: f32[2,1,128], index: 0, kind: input, shape index: {}]   ;;  %s1996_s1 = inlined_call_operand.vmem [shape: bf16[2,128,32], index: 1, kind: input, shape index: {}]   ;;  %s1997_s2 = inlined_call_operand.vmem [shape: bf16[2,32,16], index: 2, kind: input, shape index: {}]   ;;  %s1998_s3 = inlined_call_operand.vmem [shape: bf16[2,32,16], index: 3, kind: input, shape index: {}]   ;;  %s1999_s4 = inlined_call_operand.vmem [shape: f32[2,1,16], index: 4, kind: input, shape index: {}]   ;;  %s2000_s5 = inlined_call_operand.vmem [shape: f32[2,1,16], index: 5, kind: input, shape index: {}]   ;;  %s2001_s6 = inlined_call_operand.hbm [shape: f32[2,2,128,128], index: 6, kind: output, shape index: {}]  }
   0x1   :  { %13 = vsyncpa [#allocation4 + $0x1], 0  ;;  %s1625_s21 = smov 0   ;;  %s1627_s22 = smov 0  }
   0x2   :  { %s1629_s23 = smov 0   ;;  %s1631_s24 = smov 0  }
   0x3   :  { %s1633_s25 = smov 0   ;;  %s1635_s26 = smov 0  }
   0x4   :  { %s1637_s27 = smov 0   ;;  %s1639_s28 = smov 0  }
   0x5 LB: > { %s1190_s29 = sadd.s32 4294967295, %s1585_s28   ;;  %s1191_s30 = sadd.s32 4294967294, %s1585_s28   ;;  %s1585_s28 = sphi %s1639_s28, %s19_s28   ;;  %s1581_s27 = sphi %s1637_s27, %s2010_s27   ;;  %s1577_s26 = sphi %s1635_s26, %s2009_s26   ;;  %s1573_s25 = sphi %s1633_s25, %s2008_s25   ;;  %s1569_s24 = sphi %s1631_s24, %s2007_s24   ;;  %s1565_s23 = sphi %s1629_s23, %s2006_s23   ;;  %s1561_s22 = sphi %s1627_s22, %s2005_s22   ;;  %s1557_s21 = sphi %s1625_s21, %s2004_s21  }
   0x6   : > { %s34_s7 = sadd.s32 1, %s1577_s26  ;;  %s38_s8 = sadd.s32 1, %s1581_s27 }
   0x7   : > { %p36_p0 = scmp.ge.s32.totalorder %s34_s7, 2  ;;  %p215_p1 = scmp.ne.s32.totalorder %s1565_s23, %s1561_s22 }
   0x8   : > { %p216_p2 = scmp.eq.s32.totalorder %s1190_s29, 3  ;;  %p221_p5 = scmp.ne.s32.totalorder %s1561_s22, %s1557_s21 }
   0x9   : > { %s2012_s7 = smov (%p36_p0, %s34_s7), 0  ;;  %s2014_s8 = smov (!%p36_p0, %s38_s8), %s1581_s27 }
   0xa   : > { %s199_s9 = ssub.s32 %s1577_s26, %s2012_s7  ;;  %p1676_p3 = por %p216_p2, %p215_p1 }
   0xb   : > { %p40_p4 = scmp.ge.s32.totalorder %s2014_s8, 2  ;;  %p222_p6 = scmp.eq.s32.totalorder %s1191_s30, 3 }
   0xc   : > { %p1194_p7 = scmp.ge.s32.totalorder %s1585_s28, 1  ;;  %p282_p9 = scmp.lt.s32.totalorder %s1585_s28, 5 }
   0xd   : > { %s2016_s8 = smov (%p40_p4, %s2014_s8), 0  ;;  %p1685_p8 = por %p222_p6, %p221_p5 }
   0xe   : > { %s198_s12 = ssub.s32 %s1581_s27, %s2016_s8  ;;  %s205_s13 = sadd.s32 1, %s1565_s23 }
   0xf   : > { %s200_s14 = sor.u32 %s199_s9, %s198_s12  ;;  %p283_p10 = pnand %p1194_p7, %p282_p9 }
  0x10   : > { %p203_p11 = scmp.eq.s32.totalorder %s200_s14, 0  ;;  %p339_p12 = scmp.lt.s32.totalorder (!%p283_p10), %s1569_s24, 1  ;;  %vm440_vm0 = vcmask (!%p283_p10), 261120   ;;  %vm570_vm1 = vcmask (!%p283_p10), 130048  }
  0x11   : > { %286 = sbr.rel (%p283_p10) target bundleno = 568 (0x238), region = 44  ;;  %p331_p13 = scmp.lt.s32.totalorder (!%p283_p10), %s1573_s25, 1 }
  0x12   : > { %s1694_s15 = scalar_select %p203_p11, %s1565_s23, %s205_s13  }
  0x18   : > { %s1699_s16 = scalar_select %p339_p12, %s1569_s24, 1 }
  0x19   : > { %s1702_s17 = scalar_select %p331_p13, %s1573_s25, 1 }
  0x1a   : > { %s1256_s18 = sshll.u32 %s1699_s16, 4 }
  0x1b   : > { %s348_s29 = scalar_lea.vmem %s1998_s3, %s1256_s18  ;;  %s1255_s30 = sshll.u32 %s1702_s17, 6 }
  0x1c   : > { %v1471_v0 = vld [vmem:[%s348_s29] sm:$0xff]   ;;  %s1712_s13 = scalar_lea.vmem %s1996_s1, %s1255_s30  ;;  %v1472_v1 = vld [vmem:[%s348_s29 + $0x8] sm:$0xff]   ;;  %s343_s20 = scalar_lea.vmem %s1997_s2, %s1256_s18 }
  0x1d   : > { %1294 = vmatprep.subr.bf16.mxu0 %v1471_v0  ;;  %v1473_v2 = vld [vmem:[%s1712_s13] sm:$0xff]   ;;  %v1474_v3 = vld [vmem:[%s1712_s13 + $0x8] sm:$0xff]   ;;  %v1475_v4 = vld [vmem:[%s1712_s13 + $0x10] sm:$0xff]   ;;  %s354_s30 = scalar_lea.vmem %s2000_s5, %s1699_s16  ;;  %s1251_s29 = sshll.u32 %s1573_s25, 5 }
  0x1e   : > { %1295 = vmatpush3.bf16.msra.mxu0 %v1471_v0  ;;  %1298 = vmatprep.mubr.msk.bf16.mxu0 %vm440_vm0, %v1473_v2  ;;  %v1480_v5 = vld [vmem:[%s343_s20] sm:$0xff]   ;;  %v1482_v6 = vld [vmem:[%s343_s20 + $0x8] sm:$0xff]   ;;  %v1476_v8 = vld [vmem:[%s1712_s13 + $0x18] sm:$0xff]   ;;  %s333_s20 = scalar_lea.vmem %s1995_s0, %s1702_s17  ;;  %s1250_s17 = sshll.u32 %s1569_s24, 4 }
  0x1f   : > { %1296 = vmatprep.subr.bf16.mxu0 %v1472_v1  ;;  %1314 = vmatprep.subr.bf16.mxu1 %v1480_v5  ;;  %v1483_v7 = vld [vmem:[%s1712_s13] sm:$0xff]   ;;  %v1484_v10 = vld [vmem:[%s1712_s13 + $0x8] sm:$0xff]   ;;  %v1485_v11 = vld [vmem:[%s1712_s13 + $0x10] sm:$0xff]   ;;  %s1906_s24 = sadd.s32 %s1251_s29, %s1250_s17 }
  0x20   : > { %1315 = vmatpush3.bf16.msra.mxu1 %v1480_v5  ;;  %v1477_v9 = vld [vmem:[%s1712_s13 + $0x20] sm:$0xff]   ;;  %1318 = vmatprep.mubr.msk.bf16.mxu1 %vm440_vm0, %v1483_v7  ;;  %v1478_v12 = vld [vmem:[%s1712_s13 + $0x28] sm:$0xff]   ;;  %v1479_v13 = vld [vmem:[%s1712_s13 + $0x30] sm:$0xff]   ;;  %s1252_s25 = sshll.u32 %s1906_s24, 7 }
  0x21   : > { %1316 = vmatprep.subr.bf16.mxu1 %v1482_v6  ;;  %v1486_v14 = vld [vmem:[%s1712_s13 + $0x18] sm:$0xff]   ;;  %v1487_v15 = vld [vmem:[%s1712_s13 + $0x20] sm:$0xff]   ;;  %v1488_v17 = vld [vmem:[%s1712_s13 + $0x28] sm:$0xff]   ;;  %s1931_s14 = scalar_lea.hbm %s2001_s6, %s1252_s25 }
  0x22   : > { %1297 = vmatpush3.bf16.msra.mxu0 %v1472_v1  ;;  %v1481_v16 = vld [vmem:[%s1712_s13 + $0x38] sm:$0xff]   ;;  %v1489_v18 = vld [vmem:[%s1712_s13 + $0x30] sm:$0xff]   ;;  %v1753_v20 = vld [vmem:[%s354_s30] ss:$0 sm:$0xff] }
  0x23   : > { %v1490_v19 = vld [vmem:[%s1712_s13 + $0x38] sm:$0xff]   ;;  %s351_s13 = scalar_lea.vmem %s1999_s4, %s1699_s16  ;;  %s328_s16 = sand.u32 1, %s1561_s22  }
  0x24   : > { %1317 = vmatpush3.bf16.msra.mxu1 %v1482_v6  ;;  %v1764_v31 = vld [vmem:[%s351_s13] ss:$0 sm:$0xff]  ;;  %s1869_s18 = sshll.u32 %s328_s16, 7  ;;  %s1943_s19 = scalar_lea.sflag [#allocation4], %s328_s16 }
  0x25   : > { %1299 = vmatmul.mubr.msk.bf16.vlgmr.msra.gmra.mrb[0].mxu0 %vm440_vm0, %v1474_v3  ;;  %s1893_s30 = scalar_lea.vmem [#allocation3], %s1869_s18  ;;  %s1587_s18 = smov [#allocation3]  }
  0x26   : > { %1302 = vmatprep.mubr.msk.bf16.mxu0 %vm440_vm0, %v1475_v4  ;;  %s1056_s9 = sshll.u32 %s1893_s30, 4  ;;  %s1495_s17 = sshll.u32 %s1587_s18, 4  ;;  %s1933_s9 = int_to_ptr.vmem [resolvable:$true] %s1056_s9  ;;  %s1496_s17 = int_to_ptr.vmem [resolvable:$false] %s1495_s17 }
  0x27   : > { %1319 = vmatmul.mubr.msk.bf16.vlgmr.msra.gmra.mrb[0].mxu1 %vm440_vm0, %v1484_v10  ;;  %s1497_s29 = scalar_lea.vmem %s1496_s17, 4096  ;;  %p1498_p4 = scmp.lt.s32.totalorder %s1933_s9, %s1496_s17 }
  0x28   : > { %1322 = vmatprep.mubr.msk.bf16.mxu1 %vm440_vm0, %v1485_v11 }
  0x2d   : > { %1303 = vmatmul.mubr.msk.bf16.gmra.mrb[4].mxu0 %vm440_vm0, %v1476_v8 }
  0x2e   : > { %1306 = vmatprep.mubr.msk.bf16.mxu0 %vm440_vm0, %v1477_v9 }
  0x2f   : > { %1323 = vmatmul.mubr.msk.bf16.gmra.mrb[4].mxu1 %vm440_vm0, %v1486_v14 }
  0x30   : > { %1326 = vmatprep.mubr.msk.bf16.mxu1 %vm440_vm0, %v1487_v15 }
  0x35   : > { %1307 = vmatmul.mubr.msk.bf16.gmra.mrb[8].mxu0 %vm440_vm0, %v1478_v12 }
  0x36   : > { %1310 = vmatprep.mubr.msk.bf16.mxu0 %vm440_vm0, %v1479_v13 }
  0x37   : > { %1327 = vmatmul.mubr.msk.bf16.gmra.mrb[8].mxu1 %vm440_vm0, %v1488_v17 }
  0x38   : > { %1330 = vmatprep.mubr.msk.bf16.mxu1 %vm440_vm0, %v1489_v18 }
  0x3d   : > { %1311 = vmatmul.mubr.msk.bf16.gmra.mrb[12].mxu0 %vm440_vm0, %v1481_v16 }
  0x3f   : > { %1331 = vmatmul.mubr.msk.bf16.gmra.mrb[12].mxu1 %vm440_vm0, %v1490_v19 }
  0xf8   : > { %v1300_v21 = vpop.f32.mrb[0].mxu0 }
  0xf9   : > { %v508_v22 = vadd.f32 %v1300_v21, %v1753_v20  ;;  %v499_v23 = vpop.f32.mrb[1].mxu0 }
  0xfa   : > { %v500_v24 = vadd.f32 %v1753_v20, %v499_v23  ;;  %v1301_v25 = vpop.f32.mrb[2].mxu0  ;;  %v1320_v37 = vpop.f32.mrb[0].mxu1 }
  0xfb   : > { %v511_v26 = vadd.f32 %v1301_v25, %v1753_v20  ;;  %v502_v27 = vpop.f32.mrb[3].mxu0  ;;  %v1771_v40 = vadd.f32 %v1320_v37, %v1764_v31  ;;  %v722_v41 = vpop.f32.mrb[1].mxu1 }
  0xfc   : > { %v503_v28 = vadd.f32 %v1753_v20, %v502_v27  ;;  %v723_v43 = vadd.f32 %v1764_v31, %v722_v41  ;;  %v1321_v44 = vpop.f32.mrb[2].mxu1 }
  0xfd   : > { %v563_v29 = vpack.c.bf16 %v511_v26, %v508_v22  ;;  %v1776_v46 = vadd.f32 %v1321_v44, %v1764_v31  ;;  %v725_v47 = vpop.f32.mrb[3].mxu1 }
  0xfe   : > { %v562_v30 = vpack.c.bf16 %v503_v28, %v500_v24  ;;  %v726_v49 = vadd.f32 %v1764_v31, %v725_v47 }
  0xff   : > { %572 = vst.msk [vmem:[#allocation2 + $0x8] sm:$0xff] %vm570_vm1, %v563_v29  ;;  %v786_v51 = vpack.c.bf16 %v1776_v46, %v1771_v40  ;;  %v802_v40 = vlaneseq }
 0x100   : > { %571 = vst.msk [vmem:[#allocation2] sm:$0xff] %vm570_vm1, %v562_v30  ;;  %v1304_v32 = vpop.f32.mrb[4].mxu0  ;;  %v785_v54 = vpack.c.bf16 %v726_v49, %v723_v43 }
 0x101   : > { %v524_v33 = vadd.f32 %v1304_v32, %v1753_v20  ;;  %v515_v34 = vpop.f32.mrb[5].mxu0  ;;  %v803_v46 = vshrl.u32 %v802_v40, 7 }
 0x102   : > { %v516_v35 = vadd.f32 %v1753_v20, %v515_v34  ;;  %v1305_v36 = vpop.f32.mrb[6].mxu0  ;;  %v1324_v60 = vpop.f32.mrb[4].mxu1  ;;  %1350 = vmatprep.mubr.msk.bf16.mxu0 %vm570_vm1, %v785_v54 }
 0x103   : > { %v527_v38 = vadd.f32 %v1305_v36, %v1753_v20  ;;  %v518_v39 = vpop.f32.mrb[7].mxu0  ;;  %v1792_v63 = vadd.f32 %v1324_v60, %v1764_v31  ;;  %v738_v0 = vpop.f32.mrb[5].mxu1  ;;  %v806_v60 = vadd.s32 24, %v803_v46 }
 0x104   : > { %v519_v42 = vadd.f32 %v1753_v20, %v518_v39  ;;  %v1797_v2 = vadd.f32 %v1764_v31, %v738_v0  ;;  %v1325_v3 = vpop.f32.mrb[6].mxu1  ;;  %v1871_v0 = vld [vmem:[%s333_s20] ss:$0 sm:$0xff]  ;;  %s1491_s20 = scalar_lea.vmem %s1933_s9, 2048 }
 0x105   : > { %v565_v45 = vpack.c.bf16 %v527_v38, %v524_v33  ;;  %v1800_v5 = vadd.f32 %v1325_v3, %v1764_v31  ;;  %v741_v6 = vpop.f32.mrb[7].mxu1  ;;  %v809_v3 = vadd.s32 48, %v803_v46  ;;  %p1492_p0 = scmp.ne.s32.totalorder %s1933_s9, %s1491_s20  ;;  %p1499_p5 = scmp.lt.s32.totalorder %s1497_s29, %s1491_s20 }
 0x106   : > { %v564_v48 = vpack.c.bf16 %v519_v42, %v516_v35  ;;  %v794_v55 = vld [vmem:[#allocation2 + $0x8] sm:$0xff]  ;;  %v1803_v8 = vadd.f32 %v1764_v31, %v741_v6 }
 0x107   : > { %574 = vst.msk [vmem:[#allocation2 + $0x18] sm:$0xff] %vm570_vm1, %v565_v45  ;;  %v793_v50 = vld [vmem:[#allocation2] sm:$0xff]  ;;  %v788_v10 = vpack.c.bf16 %v1800_v5, %v1792_v63  ;;  %v905_v11 = vsel %vm570_vm1, %v794_v55, 0  ;;  %v812_v63 = vadd.s32 72, %v803_v46  ;;  %p1493_p1 = pnand %p1492_p0, %p1676_p3  ;;  %p1500_p6 = por %p1499_p5, %p1498_p4 }
 0x108   : > { %573 = vst.msk [vmem:[#allocation2 + $0x10] sm:$0xff] %vm570_vm1, %v564_v48  ;;  %1382 = vmatprep.subr.msk.bf16.mxu0 %vm570_vm1, %v793_v50  ;;  %1383 = vmatprep.subr.msk.bf16.mxu1 %vm570_vm1, %v793_v50  ;;  %v902_v52 = vsel %vm570_vm1, %v793_v50, 0  ;;  %v1308_v53 = vpop.f32.mrb[8].mxu0  ;;  %v787_v13 = vpack.c.bf16 %v1803_v8, %v1797_v2 }
 0x109   : > { %1335 = vmatpush3.bf16.xpose.msra.mxu0 %v902_v52  ;;  %1374 = vmatpush3.bf16.xpose.msra.mxu1 %v902_v52  ;;  %v540_v56 = vadd.f32 %v1308_v53, %v1753_v20  ;;  %v531_v57 = vpop.f32.mrb[9].mxu0  ;;  %p1494_p2 = pneg %p1493_p1 }
 0x10a   : > { %1384 = vmatprep.subr.msk.bf16.mxu0 %vm570_vm1, %v794_v55  ;;  %1385 = vmatprep.subr.msk.bf16.mxu1 %vm570_vm1, %v794_v55  ;;  %v532_v58 = vadd.f32 %v1753_v20, %v531_v57  ;;  %v1309_v59 = vpop.f32.mrb[10].mxu0  ;;  %v1328_v18 = vpop.f32.mrb[8].mxu1  ;;  %v1860_v57 = vand.u32 127, %v802_v40 }
 0x10b   : > { %v543_v61 = vadd.f32 %v1309_v59, %v1753_v20  ;;  %v534_v62 = vpop.f32.mrb[11].mxu0  ;;  %v763_v22 = vadd.f32 %v1328_v18, %v1764_v31  ;;  %v754_v23 = vpop.f32.mrb[9].mxu1  ;;  %v811_v59 = vadd.s32 64, %v803_v46  ;;  %p1501_p7 = pnand %p1500_p6, %p1494_p2 }
 0x10c   : > { %v535_v1 = vadd.f32 %v1753_v20, %v534_v62  ;;  %v755_v25 = vadd.f32 %v1764_v31, %v754_v23  ;;  %v1329_v26 = vpop.f32.mrb[10].mxu1  ;;  %v804_v62 = vadd.s32 8, %v803_v46  ;;  %vm838_vm4 = vcmp.gt.s32.totalorder %v1860_v57, %v803_v46 }
 0x10d   : > { %v567_v4 = vpack.c.bf16 %v543_v61, %v540_v56  ;;  %v766_v28 = vadd.f32 %v1329_v26, %v1764_v31  ;;  %v757_v29 = vpop.f32.mrb[11].mxu1  ;;  %v814_v61 = vadd.s32 88, %v803_v46  ;;  %vm846_vm5 = vcmp.gt.s32.totalorder %v1860_v57, %v811_v59 }
 0x10e   : > { %v566_v7 = vpack.c.bf16 %v535_v1, %v532_v58  ;;  %v758_v32 = vadd.f32 %v1764_v31, %v757_v29  ;;  %v813_v58 = vadd.s32 80, %v803_v46  ;;  %vm841_vm6 = vcmp.gt.s32.totalorder %v1860_v57, %v806_v60 }
 0x10f   : > { %v795_v9 = vld [vmem:[#allocation2 + $0x10] sm:$0xff]  ;;  %576 = vst.msk [vmem:[#allocation2 + $0x28] sm:$0xff] %vm570_vm1, %v567_v4  ;;  %v790_v33 = vpack.c.bf16 %v766_v28, %v763_v22  ;;  %vm849_vm7 = vcmp.gt.s32.totalorder %v1860_v57, %v814_v61  ;;  %vm839_vm8 = vcmp.gt.s32.totalorder %v1860_v57, %v804_v62  ;;  %vm847_vm9 = vcmp.gt.s32.totalorder %v1860_v57, %v812_v63 }
 0x110   : > { %575 = vst.msk [vmem:[#allocation2 + $0x20] sm:$0xff] %vm570_vm1, %v566_v7  ;;  %v1312_v12 = vpop.f32.mrb[12].mxu0  ;;  %v908_v34 = vsel %vm570_vm1, %v795_v9, 0  ;;  %v789_v35 = vpack.c.bf16 %v758_v32, %v755_v25  ;;  %vm848_vm3 = vcmp.gt.s32.totalorder %v1860_v57, %v813_v58  ;;  %v860_v4 = vsel %vm838_vm4, %v1871_v0, -1e+12 }
 0x111   : > { %1337 = vmatpush3.bf16.xpose.msra.mxu0 %v905_v11  ;;  %1375 = vmatpush3.bf16.xpose.msra.mxu1 %v905_v11  ;;  %v556_v14 = vadd.f32 %v1312_v12, %v1753_v20  ;;  %v547_v15 = vpop.f32.mrb[13].mxu0  ;;  %v870_v2 = vsel %vm848_vm3, %v1871_v0, -1e+12  ;;  %v868_v5 = vsel %vm846_vm5, %v1871_v0, -1e+12  ;;  %vm844_vm10 = vcmp.gt.s32.totalorder %v1860_v57, %v809_v3 }
 0x112   : > { %1386 = vmatprep.subr.msk.bf16.mxu0 %vm570_vm1, %v795_v9  ;;  %1387 = vmatprep.subr.msk.bf16.mxu1 %vm570_vm1, %v795_v9  ;;  %v548_v16 = vadd.f32 %v1753_v20, %v547_v15  ;;  %v1313_v17 = vpop.f32.mrb[14].mxu0  ;;  %v1332_v36 = vpop.f32.mrb[12].mxu1  ;;  %v863_v6 = vsel %vm841_vm6, %v1871_v0, -1e+12  ;;  %v871_v7 = vsel %vm849_vm7, %v1871_v0, -1e+12 }
 0x113   : > { %v559_v19 = vadd.f32 %v1313_v17, %v1753_v20  ;;  %v550_v21 = vpop.f32.mrb[15].mxu0  ;;  %v779_v37 = vadd.f32 %v1332_v36, %v1764_v31  ;;  %1358 = vmatprep.mubr.msk.bf16.mxu1 %vm570_vm1, %v789_v35  ;;  %v770_v38 = vpop.f32.mrb[13].mxu1  ;;  %v861_v8 = vsel %vm839_vm8, %v1871_v0, -1e+12  ;;  %v817_v9 = vadd.s32 112, %v803_v46 }
 0x114   : > { %v551_v24 = vadd.f32 %v1753_v20, %v550_v21  ;;  %v796_v20 = vld [vmem:[#allocation2 + $0x18] sm:$0xff]  ;;  %v771_v39 = vadd.f32 %v1764_v31, %v770_v38  ;;  %v1333_v41 = vpop.f32.mrb[14].mxu1  ;;  %v810_v15 = vadd.s32 56, %v803_v46  ;;  %v818_v21 = vadd.s32 120, %v803_v46 }
 0x115   : > { %v569_v27 = vpack.c.bf16 %v559_v19, %v556_v14  ;;  %v782_v42 = vadd.f32 %v1333_v41, %v1764_v31  ;;  %v773_v43 = vpop.f32.mrb[15].mxu1  ;;  %v911_v48 = vsel %vm570_vm1, %v796_v20, 0  ;;  %v815_v14 = vadd.s32 96, %v803_v46 }
 0x116   : > { %v568_v30 = vpack.c.bf16 %v551_v24, %v548_v16  ;;  %v774_v44 = vadd.f32 %v1764_v31, %v773_v43  ;;  %v798_v52 = vld [vmem:[#allocation2 + $0x28] sm:$0xff]  ;;  %v808_v26 = vadd.s32 40, %v803_v46  ;;  %vm852_vm11 = vcmp.gt.s32.totalorder %v1860_v57, %v817_v9 }
 0x117   : > { %578 = vst.msk [vmem:[#allocation2 + $0x38] sm:$0xff] %vm570_vm1, %v569_v27  ;;  %v797_v45 = vld [vmem:[#allocation2 + $0x20] sm:$0xff]  ;;  %v792_v47 = vpack.c.bf16 %v782_v42, %v779_v37  ;;  %v917_v53 = vsel %vm570_vm1, %v798_v52, 0  ;;  %v816_v27 = vadd.s32 104, %v803_v46  ;;  %vm850_vm13 = vcmp.gt.s32.totalorder %v1860_v57, %v815_v14 }
 0x118   : > { %577 = vst.msk [vmem:[#allocation2 + $0x30] sm:$0xff] %vm570_vm1, %v568_v30  ;;  %v791_v49 = vpack.c.bf16 %v774_v44, %v771_v39  ;;  %v914_v50 = vsel %vm570_vm1, %v797_v45, 0  ;;  %vm845_vm14 = vcmp.gt.s32.totalorder %v1860_v57, %v810_v15  ;;  %vm853_vm15 = vcmp.gt.s32.totalorder %v1860_v57, %v818_v21 }
 0x119   : > { %1339 = vmatpush3.bf16.xpose.msra.mxu0 %v908_v34  ;;  %1376 = vmatpush3.bf16.xpose.msra.mxu1 %v908_v34  ;;  %v866_v35 = vsel %vm844_vm10, %v1871_v0, -1e+12  ;;  %vm843_vm0 = vcmp.gt.s32.totalorder %v1860_v57, %v808_v26  ;;  %v872_v37 = vsel %vm850_vm13, %v1871_v0, -1e+12  ;;  %v867_v38 = vsel %vm845_vm14, %v1871_v0, -1e+12 }
 0x11a   : > { %1388 = vmatprep.subr.msk.bf16.mxu0 %vm570_vm1, %v796_v20  ;;  %1389 = vmatprep.subr.msk.bf16.mxu1 %vm570_vm1, %v796_v20  ;;  %v874_v20 = vsel %vm852_vm11, %v1871_v0, -1e+12  ;;  %v875_v42 = vsel %vm853_vm15, %v1871_v0, -1e+12 }
 0x11e   : > { %v800_v55 = vld [vmem:[#allocation2 + $0x38] sm:$0xff] }
 0x11f   : > { %v799_v31 = vld [vmem:[#allocation2 + $0x30] sm:$0xff]  ;;  %v923_v56 = vsel %vm570_vm1, %v800_v55, 0 }
 0x120   : > { %v920_v54 = vsel %vm570_vm1, %v799_v31, 0 }
 0x121   : > { %1341 = vmatpush3.bf16.xpose.msra.mxu0 %v911_v48  ;;  %1377 = vmatpush3.bf16.xpose.msra.mxu1 %v911_v48  ;;  %v865_v48 = vsel %vm843_vm0, %v1871_v0, -1e+12 }
 0x122   : > { %1390 = vmatprep.subr.msk.bf16.mxu0 %vm570_vm1, %v797_v45  ;;  %1391 = vmatprep.subr.msk.bf16.mxu1 %vm570_vm1, %v797_v45 }
 0x129   : > { %1343 = vmatpush3.bf16.xpose.msra.mxu0 %v914_v50  ;;  %1378 = vmatpush3.bf16.xpose.msra.mxu1 %v914_v50 }
 0x12a   : > { %1392 = vmatprep.subr.msk.bf16.mxu0 %vm570_vm1, %v798_v52  ;;  %1393 = vmatprep.subr.msk.bf16.mxu1 %vm570_vm1, %v798_v52 }
 0x131   : > { %1345 = vmatpush3.bf16.xpose.msra.mxu0 %v917_v53  ;;  %1379 = vmatpush3.bf16.xpose.msra.mxu1 %v917_v53 }
 0x132   : > { %1394 = vmatprep.subr.msk.bf16.mxu0 %vm570_vm1, %v799_v31  ;;  %1395 = vmatprep.subr.msk.bf16.mxu1 %vm570_vm1, %v799_v31 }
 0x139   : > { %1347 = vmatpush3.bf16.xpose.msra.mxu0 %v920_v54  ;;  %1380 = vmatpush3.bf16.xpose.msra.mxu1 %v920_v54 }
 0x13a   : > { %1396 = vmatprep.subr.msk.bf16.mxu0 %vm570_vm1, %v800_v55  ;;  %1397 = vmatprep.subr.msk.bf16.mxu1 %vm570_vm1, %v800_v55 }
 0x141   : > { %1349 = vmatpush3.bf16.xpose.msra.mxu0 %v923_v56  ;;  %1381 = vmatpush3.bf16.xpose.msra.mxu1 %v923_v56 }
 0x148   : > { %1351 = vmatmul.mubr.msk.bf16.vlgmr.msra.gmra.mrb[16].mxu0 %vm570_vm1, %v786_v51  ;;  %1359 = vmatmul.mubr.msk.bf16.vlgmr.msra.gmra.mrb[16].mxu1 %vm570_vm1, %v790_v33  ;;  %v805_v51 = vadd.s32 16, %v803_v46 }
 0x149   : > { %1354 = vmatprep.mubr.msk.bf16.mxu0 %vm570_vm1, %v787_v13  ;;  %1362 = vmatprep.mubr.msk.bf16.mxu1 %vm570_vm1, %v791_v49  ;;  %v869_v13 = vsel %vm847_vm9, %v1871_v0, -1e+12 }
 0x14a   : > { %vm840_vm2 = vcmp.gt.s32.totalorder %v1860_v57, %v805_v51 }
 0x14b   : > { %v862_v1 = vsel %vm840_vm2, %v1871_v0, -1e+12 }
 0x150   : > { %1355 = vmatmul.mubr.msk.bf16.gmra.mrb[20].mxu0 %vm570_vm1, %v788_v10  ;;  %1363 = vmatmul.mubr.msk.bf16.gmra.mrb[20].mxu1 %vm570_vm1, %v792_v47  ;;  %v807_v10 = vadd.s32 32, %v803_v46  ;;  %vm851_vm1 = vcmp.gt.s32.totalorder %v1860_v57, %v816_v27 }
 0x151   : > { %v873_v49 = vsel %vm851_vm1, %v1871_v0, -1e+12 }
 0x152   : > { %vm842_vm12 = vcmp.gt.s32.totalorder %v1860_v57, %v807_v10 }
 0x153   : > { %v864_v36 = vsel %vm842_vm12, %v1871_v0, -1e+12 }
 0x21b   : > { %v1352_v11 = vpop.f32.mrb[16].mxu0  ;;  %v1360_v12 = vpop.f32.mrb[16].mxu1 }
 0x21c   : > { %v968_v16 = vadd.f32 %v1352_v11, %v862_v1  ;;  %v1000_v17 = vadd.f32 %v1360_v12, %v870_v2  ;;  %v959_v18 = vpop.f32.mrb[17].mxu0  ;;  %v991_v19 = vpop.f32.mrb[17].mxu1 }
 0x21d   : > { %v960_v22 = vadd.f32 %v959_v18, %v860_v4  ;;  %v992_v23 = vadd.f32 %v991_v19, %v868_v5  ;;  %v1353_v24 = vpop.f32.mrb[18].mxu0  ;;  %v1361_v25 = vpop.f32.mrb[18].mxu1 }
 0x21e   : > { %1024 = vst [vmem:[%s1893_s30 + $0x10] sm:$0xff] %v968_v16  ;;  %1032 = vst [vmem:[%s1893_s30 + $0x50] sm:$0xff] %v1000_v17  ;;  %v971_v28 = vadd.f32 %v1353_v24, %v863_v6  ;;  %v1003_v29 = vadd.f32 %v1361_v25, %v871_v7  ;;  %v962_v30 = vpop.f32.mrb[19].mxu0  ;;  %v994_v32 = vpop.f32.mrb[19].mxu1 }
 0x21f   : > { %1022 = vst [vmem:[%s1893_s30] sm:$0xff] %v960_v22  ;;  %1030 = vst [vmem:[%s1893_s30 + $0x40] sm:$0xff] %v992_v23  ;;  %v963_v33 = vadd.f32 %v962_v30, %v861_v8  ;;  %v995_v34 = vadd.f32 %v994_v32, %v869_v13 }
 0x220   : > { %1025 = vst [vmem:[%s1893_s30 + $0x18] sm:$0xff] %v971_v28  ;;  %1033 = vst [vmem:[%s1893_s30 + $0x58] sm:$0xff] %v1003_v29 }
 0x221   : > { %1023 = vst [vmem:[%s1893_s30 + $0x8] sm:$0xff] %v963_v33  ;;  %1031 = vst [vmem:[%s1893_s30 + $0x48] sm:$0xff] %v995_v34 }
 0x223   : > { %v1356_v39 = vpop.f32.mrb[20].mxu0  ;;  %v1364_v41 = vpop.f32.mrb[20].mxu1 }
 0x224   : > { %v984_v43 = vadd.f32 %v1356_v39, %v866_v35  ;;  %v1016_v44 = vadd.f32 %v1364_v41, %v874_v20  ;;  %v975_v45 = vpop.f32.mrb[21].mxu0  ;;  %v1007_v47 = vpop.f32.mrb[21].mxu1 }
 0x225   : > { %v976_v50 = vadd.f32 %v975_v45, %v864_v36  ;;  %v1008_v52 = vadd.f32 %v1007_v47, %v872_v37  ;;  %v1357_v31 = vpop.f32.mrb[22].mxu0  ;;  %v1365_v53 = vpop.f32.mrb[22].mxu1 }
 0x226   : > { %1028 = vst [vmem:[%s1893_s30 + $0x30] sm:$0xff] %v984_v43  ;;  %1036 = vst [vmem:[%s1893_s30 + $0x70] sm:$0xff] %v1016_v44  ;;  %v987_v54 = vadd.f32 %v1357_v31, %v867_v38  ;;  %v1019_v55 = vadd.f32 %v1365_v53, %v875_v42  ;;  %v978_v56 = vpop.f32.mrb[23].mxu0  ;;  %v1010_v40 = vpop.f32.mrb[23].mxu1 }
 0x227   : > { %1026 = vst [vmem:[%s1893_s30 + $0x20] sm:$0xff] %v976_v50  ;;  %1034 = vst [vmem:[%s1893_s30 + $0x60] sm:$0xff] %v1008_v52  ;;  %v979_v46 = vadd.f32 %v978_v56, %v865_v48  ;;  %v1011_v51 = vadd.f32 %v1010_v40, %v873_v49 }
 0x228   : > { %1029 = vst [vmem:[%s1893_s30 + $0x38] sm:$0xff] %v987_v54  ;;  %1037 = vst [vmem:[%s1893_s30 + $0x78] sm:$0xff] %v1019_v55 }
 0x229   : > { %1027 = vst [vmem:[%s1893_s30 + $0x28] sm:$0xff] %v979_v46  ;;  %1035 = vst [vmem:[%s1893_s30 + $0x68] sm:$0xff] %v1011_v51 }
 0x22a   : > { %1504 = shalt.err (!%p1501_p7)
}
 0x22b   : > { %s1505_s16 = scalar_lea.hbm %s1931_s14, 2048  ;;  %s1509_s25 = scalar_lea.hbm %s2001_s6, 8192 }
 0x22c   : > { %p1506_p9 = scmp.ne.s32.totalorder %s1931_s14, %s1505_s16  ;;  %p1510_p12 = scmp.lt.u32.totalorder %s1931_s14, %s2001_s6 }
 0x22d   : > { %p1511_p13 = scmp.lt.u32.totalorder %s1509_s25, %s1505_s16  ;;  %p1513_p1 = scmp.lt.u32.totalorder %s1505_s16, %s1931_s14 }
 0x22e   : > { %p1507_p10 = pnand %p1506_p9, %p1676_p3 }
 0x22f   : > { %p1512_p0 = por %p1511_p13, %p1510_p12 }
 0x230   : > { %p1508_p11 = pneg %p1507_p10 }
 0x231   : > { %p1514_p2 = por %p1513_p1, %p1512_p0 }
 0x233   : > { %p1515_p4 = pnand %p1514_p2, %p1508_p11 }
 0x235   : > { %1518 = shalt.err (!%p1515_p4)
}
 0x236   : > { %s1588_s20 = smov 128   ;;  %s1589_s18 = smov 8  }
 0x237   : > { %1398 = dma.vmem_to_hbm [thread:$0]  (%p1676_p3), %s1933_s9, 2048, %s1931_s14, %s1943_s19, %s1588_s20, %s1588_s20, %s1589_s18  }
 0x238 PF: > { %p1404_p5 = scmp.ge.s32.totalorder %s1585_s28, 2  ;;  %s1071_s17 = sand.u32 1, %s1557_s21  }
 0x239   : > { %s1072_s29 = scalar_lea.sflag [#allocation4], %s1071_s17 }
 0x23a   : > { %p1401_p6 = pnand %p1404_p5, %p1685_p8 }
 0x23c   : > { %1552 = dma.done.wait (!%p1401_p6), %s1072_s29, 2048  }
 0x23d   : > { %1554 = vsyncadd (!%p1401_p6), %s1072_s29, 4294965248  ;;  %s19_s28 = sadd.s32 1, %s1585_s28   ;;  %s2004_s21 = smov %s1561_s22 }
 0x23e   : > { %p16_p7 = scmp.ge.s32.totalorder %s19_s28, 6   ;;  %s2005_s22 = smov %s1565_s23 }
 0x23f   : > { %s2006_s23 = smov %s1694_s15  ;;  %s2007_s24 = smov %s1577_s26 }
 0x240   : > { %s2008_s25 = smov %s1581_s27  ;;  %s2009_s26 = smov %s2012_s7 }
 0x241   : > { %s2010_s27 = smov %s2016_s8  ;;  %18 = sbr.rel (!%p16_p7) target bundleno = 5 (0x5), region = 99 }
 0x248   :  { %1077 = vsyncpa [#allocation4], 1 }
 0x249   :  { %1079 = vsyncpa [#allocation4 + $0x1], 1 }

</bundles_post_ra>
